<compile_context>
chip_gen: v7x
topology: tpu7x:2x2x1
jax: 0.10.0
libtpu: 0.0.40
codegen_flags: <defaults>
</compile_context>

<pallas_src>
import math
from functools import partial

import jax
import jax.numpy as jnp
from jax.experimental import pallas as pl
from jax.experimental.pallas import tpu as pltpu


def _ipd_kernel(index_l, index_r, use_cos, use_sin, normalize, *refs):
    """One grid step = one (batch n, time-tile t).

    refs (normalize == 'v3'): mean_ref (1,C,F,1), p_ref (1,C,F,tT), out_ref (1,M,P,F,tT)
    refs (otherwise)        : p_ref (1,C,F,tT),  out_ref (1,M,P,F,tT)
    """
    if normalize == "v3":
        mean_ref, p_ref, out_ref = refs
    else:
        mean_ref = None
        p_ref, out_ref = refs

    two_pi = 2.0 * math.pi
    inv_two_pi = 1.0 / two_pi

    # Channel-pair indices are static Python ints -> static slices, zero cost.
    for m, (il, ir) in enumerate(zip(index_l, index_r)):
        dif = (p_ref[0, il, :, :].astype(jnp.float32)
               - p_ref[0, ir, :, :].astype(jnp.float32))           # (F, tT)
        if normalize == "v3":
            # Full-T means precomputed in the wrapper -> exact under T tiling.
            dif = dif - (mean_ref[0, il, :, :] - mean_ref[0, ir, :, :])
        if use_cos:
            out_ref[0, m, 0, :, :] = jnp.cos(dif).astype(out_ref.dtype)
            if use_sin:
                out_ref[0, m, 1, :, :] = jnp.sin(dif).astype(out_ref.dtype)
        else:
            # torch.fmod(x, 2pi) = x - trunc(x/2pi)*2pi; multiply by the
            # reciprocal instead of dividing (cheaper on the VPU).
            x = dif + math.pi
            fm = x - jnp.trunc(x * inv_two_pi) * two_pi
            out_ref[0, m, 0, :, :] = (fm - math.pi).astype(out_ref.dtype)


def ipd_transform(p, ipd_index="1,0", cos=True, sin=False, normalize="none",
                  time_tile=None):
    if normalize not in ["none", "v1", "v2", "v3"]:
        raise ValueError(f"Unknown IPD normalization: {normalize}")
    if normalize in ("v1", "v2"):
        # TODO(synk): 'v1'/'v2' normalization (atan2 of circular time-means) not ported.
        raise NotImplementedError("normalize='v1'/'v2' not implemented in kernel")
    if p.ndim not in (3, 4):
        raise RuntimeError(f"IpdTransform expects 3/4D tensor, got {p.ndim}D")
    if p.ndim == 3:
        p = p[None]

    pairs = [tuple(map(int, t.split(","))) for t in ipd_index.split(";")]
    index_l = tuple(t[0] for t in pairs)
    index_r = tuple(t[1] for t in pairs)

    N, C, F, T = p.shape
    M = len(pairs)
    P = 2 if (cos and sin) else 1
    itemsize = jnp.dtype(p.dtype).itemsize

    # Time-tile selection: lane-dense (multiple of 128), sized so the
    # double-buffered input+output blocks stay well under scoped-VMEM defaults
    # on every generation (including v7x's smaller 64 MiB physical VMEM).
    if time_tile is None:
        bytes_per_t = 2 * (C * F + M * P * F) * itemsize   # x2 = double buffering
        budget = 12 * 1024 * 1024
        tT = max(128, (budget // max(bytes_per_t, 1)) // 128 * 128)
        tT = min(tT, 2048)
    else:
        tT = time_tile
    if T <= tT:
        tT = T         # full (possibly unaligned) T is legal when block == array dim
    n_t = pl.cdiv(T, tT)

    inputs = []
    in_specs = []
    if normalize == "v3":
        # Per-channel full-time mean (tiny vs p); keeps v3 exact with T tiling.
        p_mean = jnp.mean(p.astype(jnp.float32), axis=-1, keepdims=True)  # (N,C,F,1)
        inputs.append(p_mean)
        in_specs.append(pl.BlockSpec((1, C, F, 1), lambda n, t: (n, 0, 0, 0)))
    inputs.append(p)
    in_specs.append(pl.BlockSpec((1, C, F, tT), lambda n, t: (n, 0, 0, t)))

    out_specs = pl.BlockSpec((1, M, P, F, tT), lambda n, t: (n, 0, 0, 0, t))

    kernel = partial(_ipd_kernel, index_l, index_r, cos, sin, normalize)

    cost = pl.CostEstimate(
        flops=2 * N * M * F * T,
        transcendentals=(N * M * P * F * T) if cos else 0,
        bytes_accessed=(N * C * F * T + N * M * P * F * T) * itemsize,
    )

    out5 = pl.pallas_call(
        kernel,
        out_shape=jax.ShapeDtypeStruct((N, M, P, F, T), p.dtype),
        grid_spec=pltpu.PrefetchScalarGridSpec(
            num_scalar_prefetch=0,
            grid=(N, n_t),
            in_specs=in_specs,
            out_specs=out_specs,
        ),
        compiler_params=pltpu.CompilerParams(
            dimension_semantics=("parallel", "parallel"),
            vmem_limit_bytes=32 * 1024 * 1024,
        ),
        cost_estimate=cost,
    )(*inputs)

    # (N, M, P, F, T) -> (N, M*P*F, T): matches torch's cat(dim=2) + view.
    return out5.reshape(N, M * P * F, T)


def _ipd_reference(p, ipd_index="1,0", cos=True, sin=False, normalize="none"):
    """Pure-jnp replica of the PyTorch forward (for verification)."""
    pairs = [tuple(map(int, t.split(","))) for t in ipd_index.split(";")]
    il = [t[0] for t in pairs]
    ir = [t[1] for t in pairs]
    if p.ndim == 3:
        p = p[None]
    N, _, _, T = p.shape
    dif = p[:, il] - p[:, ir]
    if normalize == "v3":
        dif = dif - dif.mean(-1, keepdims=True)
    if cos:
        ipd = jnp.cos(dif)
        if sin:
            ipd = jnp.concatenate([ipd, jnp.sin(dif)], axis=2)
    else:
        two_pi = 2.0 * math.pi
        x = dif + math.pi
        ipd = (x - jnp.trunc(x / two_pi) * two_pi) - math.pi
    return ipd.reshape(N, -1, T)


if __name__ == "__main__":
    key = jax.random.PRNGKey(0)
    N, C, F, T = 2, 4, 16, 128
    p = jax.random.uniform(key, (N, C, F, T), dtype=jnp.float32,
                           minval=-math.pi, maxval=math.pi)

    configs = [
        dict(ipd_index="1,0;2,0;3,0", cos=True, sin=False, normalize="none"),
        dict(ipd_index="1,0;2,0;3,0", cos=True, sin=True, normalize="v3"),
        dict(ipd_index="1,0;3,2", cos=False, sin=False, normalize="none"),
    ]
    for cfg in configs:
        out = ipd_transform(p, **cfg)
        jax.block_until_ready(out)
        ref = _ipd_reference(p, **cfg)
        assert out.shape == ref.shape, (out.shape, ref.shape)
        assert jnp.allclose(out, ref, atol=1e-5), f"mismatch vs reference: {cfg}"

    print("KERNEL_OK")
</pallas_src>

<mosaic_0001>
module attributes {stable_mosaic.version = 11 : i64} {
  func.func @_ipd_kernel(%arg0: i32, %arg1: i32, %arg2: memref<1x4x16x128xf32, #tpu.memory_space<vmem>>, %arg3: memref<1x3x1x16x128xf32, #tpu.memory_space<vmem>>) attributes {dimension_semantics = [#tpu.dimension_semantics<parallel>, #tpu.dimension_semantics<parallel>], iteration_bounds = array<i64: 2, 1>, scalar_prefetch = 0 : i64, scratch_operands = 0 : i64, tpu.core_type = #tpu.core_type<tc>, window_params = [{transform_indices = @transform_0, window_bounds = array<i64: 1, 4, 16, 128>}, {transform_indices = @transform_1, window_bounds = array<i64: 1, 3, 1, 16, 128>}]} {
    %c0 = arith.constant 0 : index
    %c1 = arith.constant 1 : index
    %c0_0 = arith.constant 0 : index
    %c0_1 = arith.constant 0 : index
    %0 = vector.load %arg2[%c0, %c1, %c0_0, %c0_1] : memref<1x4x16x128xf32, #tpu.memory_space<vmem>>, vector<1x1x16x128xf32>
    %1 = vector.shape_cast %0 : vector<1x1x16x128xf32> to vector<16x128xf32>
    %c0_2 = arith.constant 0 : index
    %c0_3 = arith.constant 0 : index
    %c0_4 = arith.constant 0 : index
    %c0_5 = arith.constant 0 : index
    %2 = vector.load %arg2[%c0_2, %c0_3, %c0_4, %c0_5] : memref<1x4x16x128xf32, #tpu.memory_space<vmem>>, vector<1x1x16x128xf32>
    %3 = vector.shape_cast %2 : vector<1x1x16x128xf32> to vector<16x128xf32>
    %4 = arith.subf %1, %3 : vector<16x128xf32>
    %5 = math.cos %4 : vector<16x128xf32>
    %c0_6 = arith.constant 0 : index
    %c0_7 = arith.constant 0 : index
    %c0_8 = arith.constant 0 : index
    %c0_9 = arith.constant 0 : index
    %c0_10 = arith.constant 0 : index
    %6 = vector.load %arg3[%c0_6, %c0_7, %c0_8, %c0_9, %c0_10] : memref<1x3x1x16x128xf32, #tpu.memory_space<vmem>>, vector<1x1x1x16x128xf32>
    %7 = vector.shape_cast %6 : vector<1x1x1x16x128xf32> to vector<16x128xf32>
    %8 = vector.shape_cast %5 : vector<16x128xf32> to vector<1x1x1x16x128xf32>
    tpu.vector_store %arg3[%c0_6, %c0_7, %c0_8, %c0_9, %c0_10], %8 {strides = array<i32>} : memref<1x3x1x16x128xf32, #tpu.memory_space<vmem>>, vector<1x1x1x16x128xf32>,
    %c0_11 = arith.constant 0 : index
    %c2 = arith.constant 2 : index
    %c0_12 = arith.constant 0 : index
    %c0_13 = arith.constant 0 : index
    %9 = vector.load %arg2[%c0_11, %c2, %c0_12, %c0_13] : memref<1x4x16x128xf32, #tpu.memory_space<vmem>>, vector<1x1x16x128xf32>
    %10 = vector.shape_cast %9 : vector<1x1x16x128xf32> to vector<16x128xf32>
    %c0_14 = arith.constant 0 : index
    %c0_15 = arith.constant 0 : index
    %c0_16 = arith.constant 0 : index
    %c0_17 = arith.constant 0 : index
    %11 = vector.load %arg2[%c0_14, %c0_15, %c0_16, %c0_17] : memref<1x4x16x128xf32, #tpu.memory_space<vmem>>, vector<1x1x16x128xf32>
    %12 = vector.shape_cast %11 : vector<1x1x16x128xf32> to vector<16x128xf32>
    %13 = arith.subf %10, %12 : vector<16x128xf32>
    %14 = math.cos %13 : vector<16x128xf32>
    %c0_18 = arith.constant 0 : index
    %c1_19 = arith.constant 1 : index
    %c0_20 = arith.constant 0 : index
    %c0_21 = arith.constant 0 : index
    %c0_22 = arith.constant 0 : index
    %15 = vector.load %arg3[%c0_18, %c1_19, %c0_20, %c0_21, %c0_22] : memref<1x3x1x16x128xf32, #tpu.memory_space<vmem>>, vector<1x1x1x16x128xf32>
    %16 = vector.shape_cast %15 : vector<1x1x1x16x128xf32> to vector<16x128xf32>
    %17 = vector.shape_cast %14 : vector<16x128xf32> to vector<1x1x1x16x128xf32>
    tpu.vector_store %arg3[%c0_18, %c1_19, %c0_20, %c0_21, %c0_22], %17 {strides = array<i32>} : memref<1x3x1x16x128xf32, #tpu.memory_space<vmem>>, vector<1x1x1x16x128xf32>,
    %c0_23 = arith.constant 0 : index
    %c3 = arith.constant 3 : index
    %c0_24 = arith.constant 0 : index
    %c0_25 = arith.constant 0 : index
    %18 = vector.load %arg2[%c0_23, %c3, %c0_24, %c0_25] : memref<1x4x16x128xf32, #tpu.memory_space<vmem>>, vector<1x1x16x128xf32>
    %19 = vector.shape_cast %18 : vector<1x1x16x128xf32> to vector<16x128xf32>
    %c0_26 = arith.constant 0 : index
    %c0_27 = arith.constant 0 : index
    %c0_28 = arith.constant 0 : index
    %c0_29 = arith.constant 0 : index
    %20 = vector.load %arg2[%c0_26, %c0_27, %c0_28, %c0_29] : memref<1x4x16x128xf32, #tpu.memory_space<vmem>>, vector<1x1x16x128xf32>
    %21 = vector.shape_cast %20 : vector<1x1x16x128xf32> to vector<16x128xf32>
    %22 = arith.subf %19, %21 : vector<16x128xf32>
    %23 = math.cos %22 : vector<16x128xf32>
    %c0_30 = arith.constant 0 : index
    %c2_31 = arith.constant 2 : index
    %c0_32 = arith.constant 0 : index
    %c0_33 = arith.constant 0 : index
    %c0_34 = arith.constant 0 : index
    %24 = vector.load %arg3[%c0_30, %c2_31, %c0_32, %c0_33, %c0_34] : memref<1x3x1x16x128xf32, #tpu.memory_space<vmem>>, vector<1x1x1x16x128xf32>
    %25 = vector.shape_cast %24 : vector<1x1x1x16x128xf32> to vector<16x128xf32>
    %26 = vector.shape_cast %23 : vector<16x128xf32> to vector<1x1x1x16x128xf32>
    tpu.vector_store %arg3[%c0_30, %c2_31, %c0_32, %c0_33, %c0_34], %26 {strides = array<i32>} : memref<1x3x1x16x128xf32, #tpu.memory_space<vmem>>, vector<1x1x1x16x128xf32>,
    return
  }
  func.func @transform_0(%arg0: i32, %arg1: i32) -> (i32, i32, i32, i32) {
    %c0_i32 = arith.constant 0 : i32
    %c0_i32_0 = arith.constant 0 : i32
    %c0_i32_1 = arith.constant 0 : i32
    return %arg0, %c0_i32, %c0_i32_0, %arg1 : i32, i32, i32, i32
  }
  func.func @transform_1(%arg0: i32, %arg1: i32) -> (i32, i32, i32, i32, i32) {
    %c0_i32 = arith.constant 0 : i32
    %c0_i32_0 = arith.constant 0 : i32
    %c0_i32_1 = arith.constant 0 : i32
    %c0_i32_2 = arith.constant 0 : i32
    return %arg0, %c0_i32, %c0_i32_0, %c0_i32_1, %arg1 : i32, i32, i32, i32, i32
  }
}

</mosaic_0001>

<bundles_post_ra>
// kernel: tpu_custom_call.1
= control target key start
LH: loop header
LB: loop body
LE: loop exit
PB: predicated region body
PF: predicated region fallthrough
CT: control target
= control target key end

     0   :  { %6 = vsyncpa [#allocation3], 0  ;;  %s1855_s0 = inlined_call_operand.hbm [shape: f32[2,4,16,128], index: 0, kind: input, shape index: {}]   ;;  %s1856_s1 = inlined_call_operand.hbm [shape: f32[2,3,1,16,128], index: 1, kind: output, shape index: {}]  }
   0x1   :  { %8 = vsyncpa [#allocation3 + $0x1], 0 }
   0x2   :  { %9 = vsyncpa [#allocation4], 0 }
   0x3   :  { %11 = vsyncpa [#allocation4 + $0x1], 0  ;;  %s1204_s6 = smov 0   ;;  %s1206_s7 = smov 0  }
   0x4   :  { %s1208_s8 = smov 0   ;;  %s1210_s9 = smov 0  }
   0x5   :  { %s1212_s10 = smov 0   ;;  %s1214_s11 = smov 0  }
   0x6 LB: > { %s899_s12 = sadd.s32 4294967295, %s1180_s11   ;;  %s900_s13 = sadd.s32 4294967294, %s1180_s11   ;;  %s1180_s11 = sphi %s1214_s11, %s17_s11   ;;  %s1176_s10 = sphi %s1212_s10, %s1881_s10   ;;  %s1172_s9 = sphi %s1210_s9, %s1880_s9   ;;  %s1168_s8 = sphi %s1208_s8, %s1879_s8   ;;  %s1164_s7 = sphi %s1206_s7, %s1878_s7   ;;  %s1160_s6 = sphi %s1204_s6, %s1877_s6  }
   0x7   : > { %s29_s14 = sadd.s32 1, %s1176_s10  ;;  %s38_s15 = sadd.s32 1, %s1168_s8 }
   0x8   : > { %p31_p0 = scmp.ge.s32.totalorder %s29_s14, 2  ;;  %p45_p1 = scmp.ne.s32.totalorder %s1168_s8, %s1164_s7 }
   0x9   : > { %p46_p2 = scmp.eq.s32.totalorder %s1180_s11, 0  ;;  %p51_p3 = scmp.ne.s32.totalorder %s1164_s7, %s1160_s6 }
   0xa   : > { %s1883_s14 = smov (%p31_p0, %s29_s14), 0  ;;  %p52_p5 = scmp.eq.s32.totalorder %s899_s12, 0 }
   0xb   : > { %p1245_p4 = por %p46_p2, %p45_p1  ;;  %s33_s17 = ssub.s32 %s1176_s10, %s1883_s14 }
   0xc   : > { %p77_p6 = scmp.eq.s32.totalorder %s899_s12, 1  ;;  %p36_p7 = scmp.eq.s32.totalorder %s33_s17, 0 }
   0xd   : > { %p1251_p8 = por %p52_p5, %p51_p3  ;;  %p83_p10 = scmp.eq.s32.totalorder %s900_s13, 1 }
   0xe   : > { %p1255_p9 = por %p77_p6, %p45_p1  ;;  %p984_p13 = scmp.lt.s32.totalorder %s1180_s11, 2 }
   0xf   : > { %s1260_s20 = scalar_select %p36_p7, %s1168_s8, %s38_s15  }
  0x10   : > { %s1860_s19 = scalar_select %p1255_p9, 1, 0 }
  0x11   : > { %p1262_p11 = por %p83_p10, %p51_p3  ;;  %s103_s22 = sand.u32 1, %s1168_s8  }
  0x12   : > { %s903_s23 = sshll.u32 %s103_s22, 6  ;;  %s945_s24 = sshll.u32 %s1176_s10, 10 }
  0x13   : > { %s1861_s21 = scalar_select %p1262_p11, 1, 0 }
  0x14   : > { %s1273_s27 = scalar_lea.hbm %s1855_s0, %s945_s24  ;;  %s107_s28 = scalar_lea.vmem [#allocation2], %s903_s23 }
  0x15   : > { %s115_s29 = sshll.u32 %s107_s28, 4  ;;  %p1279_p0 = pnand %p984_p13, %p1245_p4  ;;  %s1275_s29 = int_to_ptr.vmem [resolvable:$true] %s115_s29 }
  0x16   : > { %s1284_s2 = scalar_lea.sflag [#allocation3], %s103_s22  ;;  %s1068_s3 = scalar_lea.hbm %s1273_s27, 1024 }
  0x17   : > { %p1069_p2 = scmp.ne.s32.totalorder %s1273_s27, %s1068_s3  ;;  %p1070_p3 = pneg %p1279_p0 }
  0x18   : > { %s1073_s12 = scalar_lea.hbm %s1855_s0, 2048  ;;  %p1074_p4 = scmp.lt.u32.totalorder %s1273_s27, %s1855_s0 }
  0x19   : > { %p1071_p5 = pnand %p1070_p3, %p1069_p2  ;;  %p1075_p7 = scmp.lt.u32.totalorder %s1073_s12, %s1068_s3 }
  0x1a   : > { %p1077_p13 = scmp.lt.u32.totalorder %s1068_s3, %s1273_s27 }
  0x1b   : > { %p1072_p6 = pneg %p1071_p5  ;;  %p1076_p10 = por %p1075_p7, %p1074_p4 }
  0x1d   : > { %p1078_p12 = por %p1077_p13, %p1076_p10 }
  0x1f   : > { %p1079_p1 = pnand %p1078_p12, %p1072_p6 }
  0x21   : > { %1082 = shalt.err (!%p1079_p1)
}
  0x22   : > { %s1083_s16 = scalar_lea.vmem %s1275_s29, 1024  ;;  %s1182_s17 = smov [#allocation2]  }
  0x23   : > { %p1084_p2 = scmp.ne.s32.totalorder %s1275_s29, %s1083_s16  ;;  %s1088_s22 = sshll.u32 %s1182_s17, 4  ;;  %s1089_s22 = int_to_ptr.vmem [resolvable:$false] %s1088_s22 }
  0x24   : > { %s1090_s23 = scalar_lea.vmem %s1089_s22, 2048  ;;  %p1091_p9 = scmp.lt.s32.totalorder %s1275_s29, %s1089_s22 }
  0x25   : > { %p1086_p5 = pnand %p1084_p2, %p1070_p3  ;;  %p1092_p4 = scmp.lt.s32.totalorder %s1090_s23, %s1083_s16 }
  0x27   : > { %p1087_p11 = pneg %p1086_p5  ;;  %p1093_p7 = por %p1092_p4, %p1091_p9 }
  0x29   : > { %p1094_p10 = pnand %p1093_p7, %p1087_p11 }
  0x2b   : > { %1097 = shalt.err (!%p1094_p10)
}
  0x2c   : > { %s1183_s24 = smov 128   ;;  %s1184_s25 = smov 8  }
  0x2d   : > { %979 = dma.hbm_to_vmem [thread:$0]  (!%p1279_p0), %s1273_s27, 1024, %s1275_s29, %s1284_s2, %s1183_s24, %s1183_s24, %s1184_s25  }
  0x2e   : > { %p123_p12 = scmp.lt.s32.totalorder %s1180_s11, 3  ;;  %p1863_p1 = scmp.ge.s32.totalorder %s1180_s11, 1 }
  0x30   : > { %p124_p3 = pnand %p1863_p1, %p123_p12 }
  0x31   : > { %s1316_s26 = sand.u32 (!%p124_p3), 1, %s1164_s7  }
  0x32   : > { %127 = sbr.rel (%p124_p3) target bundleno = 261 (0x105), region = 24  ;;  %s907_s28 = sshll.u32 (!%p124_p3), %s1316_s26, 6 }
  0x33   : > { %s130_s3 = scalar_lea.sflag (!%p124_p3), [#allocation3], %s1316_s26  ;;  %s1320_s4 = scalar_lea.vmem (!%p124_p3), [#allocation2], %s907_s28 }
  0x39   : > { %1151 = dma.done.wait (%p1251_p8), %s130_s3, 1024  }
  0x3a   : > { %1153 = vsyncadd (%p1251_p8), %s130_s3, 4294966272  ;;  %v908_v0 = vld [vmem:[%s1320_s4 + $0x10] sm:$0xff]  ;;  %v909_v1 = vld [vmem:[%s1320_s4 + $0x18] sm:$0xff]  ;;  %v1185_v37 = vmov 683565275   ;;  %s946_s18 = smul.u32 48, %s1316_s26 }
  0x3b   : > { %v1329_v2 = vld [vmem:[%s1320_s4] sm:$0xff]  ;;  %v1332_v3 = vld [vmem:[%s1320_s4 + $0x8] sm:$0xff]  ;;  %v1186_v39 = vmov 2475754826   ;;  %v1187_v41 = vmov 2131351028  }
  0x3c   : > { %v1335_v4 = vsub.f32 %v908_v0, %v1329_v2  ;;  %v918_v5 = vld [vmem:[%s1320_s4 + $0x20] sm:$0xff]  ;;  %v1339_v6 = vsub.f32 %v909_v1, %v1332_v3  ;;  %v919_v21 = vld [vmem:[%s1320_s4 + $0x28] sm:$0xff]  ;;  %v1188_v43 = vmov 2102212464   ;;  %v1189_v45 = vmov 920167782  }
  0x3d   : > { %v1342_v7 = vsub.f32 %v918_v5, %v1329_v2  ;;  %v1355_v27 = vsub.f32 %v919_v21, %v1332_v3  ;;  %v1190_v53 = vmov 1326507024   ;;  %s1632_s27 = scalar_lea.vmem [#allocation5], %s946_s18  ;;  %s971_s29 = smul.u32 768, %s1172_s9 }
  0x3e   : > { %v159_v8 = vand.u32 2147483647, %v1335_v4  ;;  %v162_v9 = vand.u32 2139095040, %v1335_v4  ;;  %v262_v10 = vand.u32 2147483647, %v1339_v6  ;;  %v265_v11 = vand.u32 2139095040, %v1339_v6 }
  0x3f   : > { %v377_v16 = vand.u32 2139095040, %v1342_v7  ;;  %v374_v31 = vand.u32 2147483647, %v1342_v7  ;;  %vm161_vm13 = vcmp.lt.s32.totalorder %v1335_v4, 0  ;;  %s814_s30 = sshll.u32 %s1632_s27, 4  ;;  %s1803_s12 = scalar_lea.hbm %s1856_s1, %s971_s29  ;;  %s1805_s30 = int_to_ptr.vmem [resolvable:$true] %s814_s30 }
  0x40   : > { %v163_v12 = vshrl.u32 %v162_v9, 23  ;;  %v166_v13 = vand.u32 8388607, %v159_v8  ;;  %v266_v14 = vshrl.u32 %v265_v11, 23  ;;  %v269_v15 = vand.u32 8388607, %v262_v10 }
  0x41   : > { %v378_v19 = vshrl.u32 %v377_v16, 23  ;;  %s800_s9 = scalar_lea.sflag [#allocation4], %s1316_s26  ;;  %s1098_s13 = scalar_lea.vmem %s1805_s30, 768 }
  0x42   : > { %v910_v17 = vadd.s32 4294967169, %v163_v12  ;;  %v914_v18 = vadd.s32 4294967169, %v266_v14  ;;  %v167_v22 = vor.u32 8388608, %v166_v13  ;;  %v270_v23 = vor.u32 8388608, %v269_v15  ;;  %p1099_p8 = scmp.ne.s32.totalorder %s1805_s30, %s1098_s13  ;;  %p1874_p9 = scmp.ne.s32.totalorder %s1860_s19, 0 }
  0x43   : > { %v920_v25 = vadd.s32 4294967169, %v378_v19  ;;  %s1191_s15 = smov [#allocation5]  }
  0x44   : > { %v169_v20 = vadd.s32 1, %v910_v17  ;;  %v272_v24 = vadd.s32 1, %v914_v18  ;;  %v1358_v32 = vshll.u32 %v167_v22, 8  ;;  %v1360_v34 = vshll.u32 %v270_v23, 8  ;;  %p1100_p11 = pnand %p1099_p8, %p1874_p9  ;;  %s1102_s16 = sshll.u32 %s1191_s15, 4  ;;  %s1103_s16 = int_to_ptr.vmem [resolvable:$false] %s1102_s16 }
  0x45   : > { %v1362_v35 = vadd.s32 1, %v920_v25  ;;  %s1104_s17 = scalar_lea.vmem %s1103_s16, 1536  ;;  %p1105_p6 = scmp.lt.s32.totalorder %s1805_s30, %s1103_s16 }
  0x46   : > { %vm170_vm0 = vcmp.gt.s32.totalorder %v169_v20, 0  ;;  %vm273_vm1 = vcmp.gt.s32.totalorder %v272_v24, 0  ;;  %p1101_p0 = pneg %p1100_p11  ;;  %p1106_p13 = scmp.lt.s32.totalorder %s1104_s17, %s1098_s13 }
  0x47   : > { %v171_v26 = vsel %vm170_vm0, %v169_v20, 0  ;;  %v274_v30 = vsel %vm273_vm1, %v272_v24, 0  ;;  %vm385_vm6 = vcmp.gt.s32.totalorder %v1362_v35, 0 }
  0x48   : > { %v172_v28 = vshrl.u32 %v171_v26, 5  ;;  %v173_v29 = vand.u32 31, %v171_v26  ;;  %v276_v33 = vand.u32 31, %v274_v30  ;;  %v1369_v47 = vshrl.u32 %v274_v30, 5  ;;  %p1107_p2 = por %p1106_p13, %p1105_p6 }
  0x4a   : > { %v174_v36 = vsub.s32 32, %v173_v29  ;;  %v176_v38 = vshll.u32 %v1185_v37, %v173_v29  ;;  %v179_v40 = vshll.u32 %v1186_v39, %v173_v29  ;;  %v182_v42 = vshll.u32 %v1187_v41, %v173_v29  ;;  %p1108_p5 = pnand %p1107_p2, %p1101_p0 }
  0x4b   : > { %v185_v44 = vshll.u32 %v1188_v43, %v173_v29  ;;  %v188_v46 = vshll.u32 %v1189_v45, %v173_v29  ;;  %vm191_vm2 = vcmp.lt.s32.totalorder %v172_v28, 1  ;;  %vm192_vm3 = vcmp.lt.s32.totalorder %v172_v28, 2 }
  0x4c   : > { %v175_v48 = vshrl.u32 %v1185_v37, %v174_v36  ;;  %v177_v49 = vshrl.u32 %v1186_v39, %v174_v36  ;;  %v180_v50 = vshrl.u32 %v1187_v41, %v174_v36  ;;  %v183_v51 = vshrl.u32 %v1188_v43, %v174_v36 }
  0x4d   : > { %v186_v52 = vshrl.u32 %v1189_v45, %v174_v36  ;;  %v189_v54 = vshrl.u32 %v1190_v53, %v174_v36  ;;  %vm194_vm4 = vcmp.lt.s32.totalorder %v172_v28, 4  ;;  %v277_v58 = vsub.s32 32, %v276_v33 }
  0x4e   : > { %v178_v55 = vor.u32 %v177_v49, %v176_v38  ;;  %v181_v56 = vor.u32 %v180_v50, %v179_v40  ;;  %v184_v57 = vor.u32 %v183_v51, %v182_v42  ;;  %vm193_vm5 = vcmp.lt.s32.totalorder %v172_v28, 3 }
  0x4f   : > { %v187_v59 = vor.u32 %v186_v52, %v185_v44  ;;  %v190_v60 = vor.u32 %v189_v54, %v188_v46  ;;  %v279_v61 = vshll.u32 %v1185_v37, %v276_v33  ;;  %v282_v12 = vshll.u32 %v1186_v39, %v276_v33 }
  0x50   : > { %v195_v62 = vsel %vm191_vm2, %v175_v48, %v178_v55  ;;  %v196_v63 = vsel %vm194_vm4, %v184_v57, 2102212464  ;;  %v199_v0 = vsel %vm191_vm2, %v178_v55, %v181_v56  ;;  %v203_v1 = vsel %vm191_vm2, %v181_v56, %v184_v57 }
  0x51   : > { %v197_v5 = vsel %vm193_vm5, %v181_v56, %v196_v63  ;;  %v200_v9 = vsel %vm194_vm4, %v187_v59, 920167782  ;;  %v204_v11 = vsel %vm194_vm4, %v190_v60, 1326507024  ;;  %v278_v15 = vshrl.u32 %v1185_v37, %v277_v58 }
  0x52   : > { %v201_v13 = vsel %vm193_vm5, %v184_v57, %v200_v9  ;;  %v205_v14 = vsel %vm193_vm5, %v187_v59, %v204_v11  ;;  %v280_v16 = vshrl.u32 %v1186_v39, %v277_v58  ;;  %v198_v17 = vsel %vm192_vm3, %v195_v62, %v197_v5 }
  0x53   : > { %v202_v18 = vsel %vm192_vm3, %v199_v0, %v201_v13  ;;  %v206_v19 = vsel %vm192_vm3, %v203_v1, %v205_v14  ;;  %v283_v20 = vshrl.u32 %v1187_v41, %v277_v58  ;;  %v285_v29 = vshll.u32 %v1187_v41, %v276_v33 }
  0x54   : > { %v1390_v21 = vmul.u32.u64.low %v1358_v32, %v206_v19  ;;  %v1391_v22 = vmul.u32.u64.high %v1358_v32, %v206_v19, %v1390_v21  ;;  %v1394_v23 = vmul.u32.u64.low %v1358_v32, %v202_v18  ;;  %v1395_v24 = vmul.u32.u64.high %v1358_v32, %v202_v18, %v1394_v23 }
  0x55   : > { %v281_v25 = vor.u32 %v280_v16, %v279_v61  ;;  %v284_v26 = vor.u32 %v283_v20, %v282_v12  ;;  %v286_v30 = vshrl.u32 %v1188_v43, %v277_v58  ;;  %v288_v28 = vshll.u32 %v1188_v43, %v276_v33 }
  0x56   : > { %v289_v36 = vshrl.u32 %v1189_v45, %v277_v58  ;;  %v291_v38 = vshll.u32 %v1189_v45, %v276_v33  ;;  %v292_v40 = vshrl.u32 %v1190_v53, %v277_v58  ;;  %v214_v42 = vmul.u32 %v1358_v32, %v198_v17 }
  0x57   : > { %v287_v44 = vor.u32 %v286_v30, %v285_v29  ;;  %vm294_vm7 = vcmp.lt.s32.totalorder %v1369_v47, 1  ;;  %vm295_vm8 = vcmp.lt.s32.totalorder %v1369_v47, 2  ;;  %vm216_vm9 = vc.u32 %v1391_v22, %v1394_v23 }
  0x58   : > { %v217_v46 = vadd.s32 1, %v1395_v24  ;;  %v290_v48 = vor.u32 %v289_v36, %v288_v28  ;;  %vm296_vm10 = vcmp.lt.s32.totalorder %v1369_v47, 3  ;;  %v293_v49 = vor.u32 %v292_v40, %v291_v38 }
  0x59   : > { %vm297_vm11 = vcmp.lt.s32.totalorder %v1369_v47, 4  ;;  %v298_v33 = vsel %vm294_vm7, %v278_v15, %v281_v25  ;;  %v302_v50 = vsel %vm294_vm7, %v281_v25, %v284_v26  ;;  %v306_v54 = vsel %vm294_vm7, %v284_v26, %v287_v44 }
  0x5a   : > { %v218_v32 = vsel %vm216_vm9, %v217_v46, %v1395_v24  ;;  %v299_v51 = vsel %vm297_vm11, %v287_v44, 2102212464  ;;  %v303_v52 = vsel %vm297_vm11, %v290_v48, 920167782  ;;  %v307_v58 = vsel %vm297_vm11, %v293_v49, 1326507024 }
  0x5b   : > { %v219_v55 = vadd.s32 %v218_v32, %v214_v42  ;;  %v300_v56 = vsel %vm296_vm10, %v284_v26, %v299_v51  ;;  %v304_v57 = vsel %vm296_vm10, %v287_v44, %v303_v52  ;;  %v308_v61 = vsel %vm296_vm10, %v290_v48, %v307_v58 }
  0x5c   : > { %v301_v59 = vsel %vm295_vm8, %v298_v33, %v300_v56  ;;  %v305_v60 = vsel %vm295_vm8, %v302_v50, %v304_v57  ;;  %v386_v62 = vsel %vm385_vm6, %v1362_v35, 0  ;;  %v309_v0 = vsel %vm295_vm8, %v306_v54, %v308_v61 }
  0x5d   : > { %v220_v63 = vadd.s32 536870912, %v219_v55  ;;  %v1423_v1 = vmul.u32.u64.low %v1360_v34, %v305_v60  ;;  %v1424_v5 = vmul.u32.u64.high %v1360_v34, %v305_v60, %v1423_v1  ;;  %v381_v12 = vand.u32 8388607, %v374_v31 }
  0x5e   : > { %v1428_v9 = vmul.u32.u64.low %v1360_v34, %v309_v0  ;;  %v1429_v11 = vmul.u32.u64.high %v1360_v34, %v309_v0, %v1428_v9  ;;  %v388_v14 = vand.u32 31, %v386_v62  ;;  %v480_v35 = vand.u32 2139095040, %v1355_v27 }
  0x5f   : > { %v1433_v13 = vshrl.u32 %v220_v63, 30  ;;  %v317_v47 = vmul.u32 %v1360_v34, %v301_v59  ;;  %v320_v16 = vadd.s32 1, %v1424_v5  ;;  %v382_v18 = vor.u32 8388608, %v381_v12 }
  0x60   : > { %v389_v17 = vsub.s32 32, %v388_v14  ;;  %vm319_vm12 = vc.u32 %v1429_v11, %v1423_v1  ;;  %v387_v21 = vshrl.u32 %v386_v62, 5  ;;  %v481_v24 = vshrl.u32 %v480_v35, 23 }
  0x61   : > { %v222_v15 = vshll.u32 %v1433_v13, 30  ;;  %v321_v20 = vsel %vm319_vm12, %v320_v16, %v1424_v5  ;;  %v391_v26 = vshll.u32 %v1185_v37, %v388_v14  ;;  %v394_v29 = vshll.u32 %v1186_v39, %v388_v14 }
  0x62   : > { %v322_v25 = vadd.s32 %v321_v20, %v317_v47  ;;  %v392_v34 = vshrl.u32 %v1186_v39, %v389_v17  ;;  %v395_v28 = vshrl.u32 %v1187_v41, %v389_v17  ;;  %v397_v36 = vshll.u32 %v1187_v41, %v388_v14 }
  0x63   : > { %v1441_v19 = vsub.s32 %v219_v55, %v222_v15  ;;  %v398_v38 = vshrl.u32 %v1188_v43, %v389_v17  ;;  %v215_v40 = vadd.s32 %v1394_v23, %v1391_v22  ;;  %v400_v44 = vshll.u32 %v1188_v43, %v388_v14 }
  0x64   : > { %v323_v42 = vadd.s32 536870912, %v322_v25  ;;  %v1454_v46 = vshll.u32 %v382_v18, 8  ;;  %v390_v49 = vshrl.u32 %v1185_v37, %v389_v17  ;;  %vm409_vm14 = vcmp.lt.s32.totalorder %v387_v21, 4 }
  0x65   : > { %v225_v30 = vsub.s32 0, %v1441_v19  ;;  %v924_v33 = vadd.s32 4294967169, %v481_v24  ;;  %v393_v32 = vor.u32 %v392_v34, %v391_v26  ;;  %v401_v51 = vshrl.u32 %v1189_v45, %v389_v17 }
  0x66   : > { %v1459_v50 = vshrl.u32 %v323_v42, 30  ;;  %v403_v22 = vshll.u32 %v1189_v45, %v388_v14  ;;  %v396_v52 = vor.u32 %v395_v28, %v394_v29  ;;  %v399_v54 = vor.u32 %v398_v38, %v397_v36 }
  0x67   : > { %v911_v48 = vmin.u32 %v225_v30, %v1441_v19  ;;  %v404_v55 = vshrl.u32 %v1190_v53, %v389_v17  ;;  %v402_v57 = vor.u32 %v401_v51, %v400_v44  ;;  %vm406_vm15 = vcmp.lt.s32.totalorder %v387_v21, 1 }
  0x68   : > { %v325_v56 = vshll.u32 %v1459_v50, 30  ;;  %vm408_vm0 = vcmp.lt.s32.totalorder %v387_v21, 3  ;;  %vm407_vm1 = vcmp.lt.s32.totalorder %v387_v21, 2  ;;  %v411_v60 = vsel %vm409_vm14, %v399_v54, 2102212464 }
  0x69   : > { %v227_v23 = vclz %v911_v48  ;;  %v405_v59 = vor.u32 %v404_v55, %v403_v22  ;;  %vm1468_vm2 = vcmp.le.f32.partialorder %v159_v8, 0.7853982  ;;  %v245_v62 = vsub.s32 4, %v1433_v13 }
  0x6a   : > { %v1473_v63 = vsub.s32 %v322_v25, %v325_v56  ;;  %v410_v0 = vsel %vm406_vm15, %v390_v49, %v393_v32  ;;  %v415_v5 = vsel %vm409_vm14, %v402_v57, 920167782  ;;  %v414_v9 = vsel %vm406_vm15, %v393_v32, %v396_v52 }
  0x6b   : > { %v912_v58 = vadd.s32 4294967294, %v227_v23  ;;  %v416_v12 = vsel %vm408_vm0, %v399_v54, %v415_v5  ;;  %v419_v14 = vsel %vm409_vm14, %v405_v59, 1326507024  ;;  %v412_v47 = vsel %vm408_vm0, %v396_v52, %v411_v60 }
  0x6c   : > { %v328_v8 = vsub.s32 0, %v1473_v63  ;;  %v418_v15 = vsel %vm406_vm15, %v396_v52, %v399_v54  ;;  %v420_v20 = vsel %vm408_vm0, %v402_v57, %v419_v14  ;;  %v246_v24 = vsel %vm161_vm13, %v245_v62, %v1433_v13 }
  0x6d   : > { %vm913_vm3 = vcmp.lt.s32.totalorder %v912_v58, 0  ;;  %v417_v26 = vsel %vm407_vm1, %v414_v9, %v416_v12  ;;  %v477_v34 = vand.u32 2147483647, %v1355_v27  ;;  %vm264_vm4 = vcmp.lt.s32.totalorder %v1339_v6, 0 }
  0x6e   : > { %v230_v35 = vsel %vm913_vm3, 0, %v912_v58  ;;  %v915_v25 = vmin.u32 %v328_v8, %v1473_v63  ;;  %v413_v28 = vsel %vm407_vm1, %v410_v0, %v412_v47  ;;  %v487_v13 = vadd.s32 1, %v924_v33 }
  0x6f   : > { %v231_v16 = vsub.s32 32, %v230_v35  ;;  %v232_v17 = vshll.u32 %v1441_v19, %v230_v35  ;;  %v235_v18 = vsub.s32 4294967266, %v230_v35  ;;  %v421_v19 = vsel %vm407_vm1, %v418_v15, %v420_v20 }
  0x70   : > { %v330_v36 = vclz %v915_v25  ;;  %v1495_v38 = vmul.u32.u64.low %v1454_v46, %v421_v19  ;;  %v1496_v42 = vmul.u32.u64.high %v1454_v46, %v421_v19, %v1495_v38  ;;  %v1507_v21 = vand.u32 8388607, %v477_v34 }
  0x71   : > { %v233_v29 = vshrl.u32 %v215_v40, %v231_v16  ;;  %v236_v30 = vadd.s32 127, %v235_v18  ;;  %v1499_v49 = vmul.u32.u64.low %v1454_v46, %v417_v26  ;;  %v1500_v32 = vmul.u32.u64.high %v1454_v46, %v417_v26, %v1499_v49 }
  0x72   : > { %v318_v40 = vadd.s32 %v1423_v1, %v1429_v11  ;;  %v916_v51 = vadd.s32 4294967294, %v330_v36  ;;  %vm488_vm5 = vcmp.gt.s32.totalorder %v487_v13, 0  ;;  %v248_v33 = vsel %vm1468_vm2, 0, %v246_v24 }
  0x73   : > { %v234_v44 = vor.u32 %v233_v29, %v232_v17  ;;  %v237_v48 = vshll.u32 %v236_v30, 23  ;;  %v489_v52 = vsel %vm488_vm5, %v487_v13, 0  ;;  %v348_v54 = vsub.s32 4, %v1459_v50 }
  0x74   : > { %vm917_vm6 = vcmp.lt.s32.totalorder %v916_v51, 0  ;;  %v429_v55 = vmul.u32 %v1454_v46, %v413_v28  ;;  %vm431_vm7 = vc.u32 %v1496_v42, %v1499_v49  ;;  %v432_v56 = vadd.s32 1, %v1500_v32 }
  0x75   : > { %v238_v22 = vor.u32 4788187, %v237_v48  ;;  %v241_v23 = vcvt.s32.f32 %v234_v44  ;;  %v333_v11 = vsel %vm917_vm6, 0, %v916_v51  ;;  %v491_v57 = vand.u32 31, %v489_v52 }
  0x76   : > { %v334_v58 = vsub.s32 32, %v333_v11  ;;  %v335_v59 = vshll.u32 %v1473_v63, %v333_v11  ;;  %v338_v60 = vsub.s32 4294967266, %v333_v11  ;;  %v485_v62 = vor.u32 8388608, %v1507_v21 }
  0x77   : > { %v239_v1 = vand.u32 2147483647, %v238_v22  ;;  %v1518_v5 = vand.u32 3, %v248_v33  ;;  %v433_v9 = vsel %vm431_vm7, %v432_v56, %v1500_v32  ;;  %v492_v46 = vsub.s32 32, %v491_v57 }
  0x78   : > { %v336_v12 = vshrl.u32 %v318_v40, %v334_v58  ;;  %v339_v14 = vadd.s32 127, %v338_v60  ;;  %v1524_v35 = vsel %vm264_vm4, %v348_v54, %v1459_v50  ;;  %v434_v8 = vadd.s32 %v433_v9, %v429_v55 }
  0x79   : > { %v242_v0 = vmul.f32 %v241_v23, %v239_v1  ;;  %v1526_v15 = vshrl.u32 %v489_v52, 5  ;;  %v494_v63 = vshll.u32 %v1185_v37, %v491_v57  ;;  %v497_v16 = vshll.u32 %v1186_v39, %v491_v57  ;;  %v930_v1 = vld [vmem:[%s1320_s4 + $0x30] sm:$0xff] }
  0x7a   : > { %vm1532_vm8 = vcmp.le.f32.partialorder %v262_v10, 0.7853982  ;;  %v337_v18 = vor.u32 %v336_v12, %v335_v59  ;;  %v340_v20 = vshll.u32 %v339_v14, 23  ;;  %v435_v24 = vadd.s32 536870912, %v434_v8 }
  0x7b   : > { %v243_v47 = vxor.u32 2147483648, %v242_v0  ;;  %v495_v50 = vshrl.u32 %v1186_v39, %v492_v46  ;;  %v498_v26 = vshrl.u32 %v1187_v41, %v492_v46  ;;  %v500_v29 = vshll.u32 %v1187_v41, %v491_v57 }
  0x7c   : > { %v501_v30 = vshrl.u32 %v1188_v43, %v492_v46  ;;  %v341_v28 = vor.u32 4788187, %v340_v20  ;;  %v344_v19 = vcvt.s32.f32 %v337_v18  ;;  %v1545_v36 = vshrl.u32 %v435_v24, 30 }
  0x7d   : > { %v244_v25 = vsel %vm161_vm13, %v243_v47, %v242_v0  ;;  %v493_v38 = vshrl.u32 %v1185_v37, %v492_v46  ;;  %v503_v13 = vshll.u32 %v1188_v43, %v491_v57  ;;  %v504_v44 = vshrl.u32 %v1189_v45, %v492_v46 }
  0x7e   : > { %v247_v10 = vsel %vm1468_vm2, %v1335_v4, %v244_v25  ;;  %v342_v48 = vand.u32 2147483647, %v341_v28  ;;  %v437_v32 = vshll.u32 %v1545_v36, 30  ;;  %v496_v40 = vor.u32 %v495_v50, %v494_v63 }
  0x7f   : > { %1044 = vcosq.f32 %v247_v10  ;;  %vm257_vm9 = vcmp.eq.s32.totalorder %v1518_v5, 2  ;;  %v499_v61 = vor.u32 %v498_v26, %v497_v16  ;;  %v505_v51 = vor.u32 %v504_v44, %v503_v13 }
  0x80   : > { %1046 = vsinq.f32 %v247_v10  ;;  %v506_v21 = vshll.u32 %v1189_v45, %v491_v57  ;;  %v507_v22 = vshrl.u32 %v1190_v53, %v492_v46  ;;  %v345_v23 = vmul.f32 %v344_v19, %v342_v48 }
  0x81   : > { %v1554_v33 = vsub.s32 %v434_v8, %v437_v32  ;;  %v502_v52 = vor.u32 %v501_v30, %v500_v29  ;;  %vm509_vm10 = vcmp.lt.s32.totalorder %v1526_v15, 1  ;;  %vm253_vm11 = vcmp.lt.s32.totalorder %v1518_v5, 2 }
  0x82   : > { %v508_v54 = vor.u32 %v507_v22, %v506_v21  ;;  %vm511_vm12 = vcmp.lt.s32.totalorder %v1526_v15, 3  ;;  %vm512_vm13 = vcmp.lt.s32.totalorder %v1526_v15, 4  ;;  %v1560_v55 = vshll.u32 %v485_v62, 8 }
  0x83   : > { %vm251_vm14 = vweird.f32 %v1335_v4  ;;  %v346_v11 = vxor.u32 2147483648, %v345_v23  ;;  %v440_v56 = vsub.s32 0, %v1554_v33  ;;  %v513_v57 = vsel %vm509_vm10, %v493_v38, %v496_v40 }
  0x84   : > { %v514_v58 = vsel %vm512_vm13, %v502_v52, 2102212464  ;;  %vm510_vm15 = vcmp.lt.s32.totalorder %v1526_v15, 2  ;;  %v517_v60 = vsel %vm509_vm10, %v496_v40, %v499_v61  ;;  %v518_v62 = vsel %vm512_vm13, %v505_v51, 920167782 }
  0x85   : > { %v515_v59 = vsel %vm511_vm12, %v499_v61, %v514_v58  ;;  %v347_v0 = vsel %vm264_vm4, %v346_v11, %v345_v23  ;;  %v351_v9 = vsel %vm1532_vm8, 0, %v1524_v35  ;;  %v921_v46 = vmin.u32 %v440_v56, %v1554_v33  ;;  %v931_v56 = vld [vmem:[%s1320_s4 + $0x38] sm:$0xff] }
  0x86   : > { %v1583_v12 = vsub.f32 %v930_v1, %v1329_v2  ;;  %v350_v14 = vsel %vm1532_vm8, %v1339_v6, %v347_v0  ;;  %v516_v8 = vsel %vm510_vm15, %v513_v57, %v515_v59  ;;  %v519_v47 = vsel %vm511_vm12, %v502_v52, %v518_v62 }
  0x87   : > { %v521_v63 = vsel %vm509_vm10, %v499_v61, %v502_v52  ;;  %1048 = vcosq.f32 %v350_v14  ;;  %v442_v35 = vclz %v921_v46  ;;  %v520_v16 = vsel %vm510_vm15, %v517_v60, %v519_v47 }
  0x88   : > { %v522_v2 = vsel %vm512_vm13, %v508_v54, 1326507024  ;;  %1050 = vsinq.f32 %v350_v14  ;;  %v1602_v20 = vmul.u32.u64.low %v1560_v55, %v520_v16  ;;  %v1603_v24 = vmul.u32.u64.high %v1560_v55, %v520_v16, %v1602_v20 }
  0x89   : > { %v1045_v18 = vpop.eup %1044  ;;  %v523_v17 = vsel %vm511_vm12, %v505_v51, %v522_v2  ;;  %vm254_vm0 = vcmp.eq.s32.totalorder %v1518_v5, 0  ;;  %v922_v26 = vadd.s32 4294967294, %v442_v35  ;;  %v355_v10 = vand.u32 3, %v351_v9 }
  0x8a   : > { %v1047_v50 = vpop.eup %1046  ;;  %v258_v25 = vxor.u32 2147483648, %v1045_v18  ;;  %v524_v29 = vsel %vm510_vm15, %v521_v63, %v523_v17  ;;  %v430_v13 = vadd.s32 %v1499_v49, %v1496_v42  ;;  %v532_v44 = vmul.u32 %v1560_v55, %v516_v8 }
  0x8b   : > { %v255_v30 = vxor.u32 2147483648, %v1047_v50  ;;  %v1610_v28 = vmul.u32.u64.low %v1560_v55, %v524_v29  ;;  %v1611_v19 = vmul.u32.u64.high %v1560_v55, %v524_v29, %v1610_v28  ;;  %vm923_vm1 = vcmp.lt.s32.totalorder %v922_v26, 0 }
  0x8c   : > { %v259_v38 = vsel %vm257_vm9, %v258_v25, %v1047_v50  ;;  %vm354_vm2 = vweird.f32 %v1339_v6  ;;  %v445_v15 = vsel %vm923_vm1, 0, %v922_v26  ;;  %v535_v32 = vadd.s32 1, %v1603_v24 }
  0x8d   : > { %v256_v48 = vsel %vm254_vm0, %v1045_v18, %v255_v30  ;;  %v593_v40 = vand.u32 2139095040, %v1583_v12  ;;  %v446_v51 = vsub.s32 32, %v445_v15  ;;  %v447_v21 = vshll.u32 %v1554_v33, %v445_v15 }
  0x8e   : > { %v260_v61 = vsel %vm253_vm11, %v256_v48, %v259_v38  ;;  %v450_v22 = vsub.s32 4294967266, %v445_v15  ;;  %v460_v49 = vsub.s32 4, %v1545_v36  ;;  %vm534_vm3 = vc.u32 %v1611_v19, %v1602_v20 }
  0x8f   : > { %v261_v42 = vsel %vm251_vm14, nan, %v260_v61  ;;  %v590_v23 = vand.u32 2147483647, %v1583_v12  ;;  %v448_v5 = vshrl.u32 %v430_v13, %v446_v51  ;;  %v536_v33 = vsel %vm534_vm3, %v535_v32, %v1603_v24 }
  0x90   : > { %365 = vst [vmem:[%s1632_s27] sm:$0xff] %v261_v42  ;;  %v451_v52 = vadd.s32 127, %v450_v22  ;;  %v594_v54 = vshrl.u32 %v593_v40, 23  ;;  %vm356_vm4 = vcmp.lt.s32.totalorder %v355_v10, 2  ;;  %vm357_vm5 = vcmp.eq.s32.totalorder %v355_v10, 0 }
  0x91   : > { %vm376_vm6 = vcmp.lt.s32.totalorder %v1342_v7, 0  ;;  %v537_v4 = vadd.s32 %v536_v33, %v532_v44  ;;  %v1049_v55 = vpop.eup %1048  ;;  %vm360_vm7 = vcmp.eq.s32.totalorder %v355_v10, 2  ;;  %v449_v1 = vor.u32 %v448_v5, %v447_v21 }
  0x92   : > { %v452_v11 = vshll.u32 %v451_v52, 23  ;;  %v932_v57 = vadd.s32 4294967169, %v594_v54  ;;  %v1051_v58 = vpop.eup %1050  ;;  %v361_v59 = vxor.u32 2147483648, %v1049_v55  ;;  %v461_v60 = vsel %vm376_vm6, %v460_v49, %v1545_v36 }
  0x93   : > { %v538_v62 = vadd.s32 536870912, %v537_v4  ;;  %v597_v0 = vand.u32 8388607, %v590_v23  ;;  %v358_v9 = vxor.u32 2147483648, %v1051_v58  ;;  %v456_v14 = vcvt.s32.f32 %v449_v1 }
  0x94   : > { %v453_v46 = vor.u32 4788187, %v452_v11  ;;  %v600_v8 = vadd.s32 1, %v932_v57  ;;  %v362_v47 = vsel %vm360_vm7, %v361_v59, %v1051_v58  ;;  %vm1645_vm8 = vcmp.le.f32.partialorder %v374_v31, 0.7853982 }
  0x95   : > { %v1649_v35 = vshrl.u32 %v538_v62, 30  ;;  %v1652_v36 = vsub.f32 %v931_v56, %v1332_v3  ;;  %v359_v16 = vsel %vm357_vm5, %v1049_v55, %v358_v9  ;;  %v463_v18 = vsel %vm1645_vm8, 0, %v461_v60 }
  0x96   : > { %v454_v2 = vand.u32 2147483647, %v453_v46  ;;  %vm601_vm9 = vcmp.gt.s32.totalorder %v600_v8, 0  ;;  %v363_v17 = vsel %vm356_vm4, %v359_v16, %v362_v47  ;;  %v598_v31 = vor.u32 8388608, %v597_v0 }
  0x97   : > { %v540_v24 = vshll.u32 %v1649_v35, 30  ;;  %v602_v50 = vsel %vm601_vm9, %v600_v8, 0  ;;  %v364_v25 = vsel %vm354_vm2, nan, %v363_v17  ;;  %v696_v30 = vand.u32 2139095040, %v1652_v36 }
  0x98   : > { %v457_v26 = vmul.f32 %v456_v14, %v454_v2  ;;  %v604_v29 = vand.u32 31, %v602_v50  ;;  %366 = vst [vmem:[%s1632_s27 + $0x8] sm:$0xff] %v364_v25  ;;  %v1665_v38 = vand.u32 3, %v463_v18  ;;  %v533_v44 = vadd.s32 %v1602_v20, %v1611_v19 }
  0x99   : > { %v1662_v3 = vsub.s32 %v537_v4, %v540_v24  ;;  %v1672_v15 = vshll.u32 %v598_v31, 8  ;;  %v603_v40 = vshrl.u32 %v602_v50, 5  ;;  %v697_v22 = vshrl.u32 %v696_v30, 23 }
  0x9a   : > { %v458_v28 = vxor.u32 2147483648, %v457_v26  ;;  %v605_v13 = vsub.s32 32, %v604_v29  ;;  %v607_v10 = vshll.u32 %v1185_v37, %v604_v29  ;;  %v610_v6 = vshll.u32 %v1186_v39, %v604_v29 }
  0x9b   : > { %v543_v48 = vsub.s32 0, %v1662_v3  ;;  %v613_v19 = vshll.u32 %v1187_v41, %v604_v29  ;;  %v616_v54 = vshll.u32 %v1188_v43, %v604_v29  ;;  %v619_v55 = vshll.u32 %v1189_v45, %v604_v29 }
  0x9c   : > { %v459_v32 = vsel %vm376_vm6, %v458_v28, %v457_v26  ;;  %v608_v61 = vshrl.u32 %v1186_v39, %v605_v13  ;;  %v611_v51 = vshrl.u32 %v1187_v41, %v605_v13  ;;  %v606_v42 = vshrl.u32 %v1185_v37, %v605_v13 }
  0x9d   : > { %v462_v21 = vsel %vm1645_vm8, %v1342_v7, %v459_v32  ;;  %v925_v20 = vmin.u32 %v543_v48, %v1662_v3  ;;  %v614_v33 = vshrl.u32 %v1188_v43, %v605_v13  ;;  %v617_v4 = vshrl.u32 %v1189_v45, %v605_v13 }
  0x9e   : > { %1052 = vcosq.f32 %v462_v21  ;;  %v609_v49 = vor.u32 %v608_v61, %v607_v10  ;;  %v612_v5 = vor.u32 %v611_v51, %v610_v6  ;;  %v620_v1 = vshrl.u32 %v1190_v53, %v605_v13 }
  0x9f   : > { %1054 = vsinq.f32 %v462_v21  ;;  %v545_v52 = vclz %v925_v20  ;;  %vm622_vm10 = vcmp.lt.s32.totalorder %v603_v40, 1  ;;  %vm469_vm11 = vcmp.eq.s32.totalorder %v1665_v38, 0 }
  0xa0   : > { %v615_v56 = vor.u32 %v614_v33, %v613_v19  ;;  %vm623_vm12 = vcmp.lt.s32.totalorder %v603_v40, 2  ;;  %vm624_vm13 = vcmp.lt.s32.totalorder %v603_v40, 3  ;;  %v618_v57 = vor.u32 %v617_v4, %v616_v54 }
  0xa1   : > { %v926_v11 = vadd.s32 4294967294, %v545_v52  ;;  %v621_v58 = vor.u32 %v620_v1, %v619_v55  ;;  %vm625_vm14 = vcmp.lt.s32.totalorder %v603_v40, 4  ;;  %v626_v59 = vsel %vm622_vm10, %v606_v42, %v609_v49 }
  0xa2   : > { %vm466_vm15 = vweird.f32 %v1342_v7  ;;  %v627_v60 = vsel %vm625_vm14, %v615_v56, 2102212464  ;;  %v630_v62 = vsel %vm622_vm10, %v609_v49, %v612_v5  ;;  %v634_v0 = vsel %vm622_vm10, %v612_v5, %v615_v56 }
  0xa3   : > { %vm927_vm0 = vcmp.lt.s32.totalorder %v926_v11, 0  ;;  %v628_v46 = vsel %vm624_vm13, %v612_v5, %v627_v60  ;;  %v631_v14 = vsel %vm625_vm14, %v618_v57, 920167782  ;;  %v635_v8 = vsel %vm625_vm14, %v621_v58, 1326507024 }
  0xa4   : > { %v548_v9 = vsel %vm927_vm0, 0, %v926_v11  ;;  %vm472_vm1 = vcmp.eq.s32.totalorder %v1665_v38, 2  ;;  %v629_v2 = vsel %vm623_vm12, %v626_v59, %v628_v46  ;;  %v632_v18 = vsel %vm624_vm13, %v615_v56, %v631_v14 }
  0xa5   : > { %v549_v47 = vsub.s32 32, %v548_v9  ;;  %v550_v63 = vshll.u32 %v1662_v3, %v548_v9  ;;  %v553_v16 = vsub.s32 4294967266, %v548_v9  ;;  %v636_v17 = vsel %vm624_vm13, %v618_v57, %v635_v8 }
  0xa6   : > { %v936_v24 = vadd.s32 4294967169, %v697_v22  ;;  %v633_v25 = vsel %vm623_vm12, %v630_v62, %v632_v18  ;;  %v637_v26 = vsel %vm623_vm12, %v634_v0, %v636_v17  ;;  %vm468_vm2 = vcmp.lt.s32.totalorder %v1665_v38, 2 }
  0xa7   : > { %v551_v31 = vshrl.u32 %v533_v44, %v549_v47  ;;  %v554_v50 = vadd.s32 127, %v553_v16  ;;  %v1700_v30 = vmul.u32.u64.low %v1672_v15, %v637_v26  ;;  %v1701_v28 = vmul.u32.u64.high %v1672_v15, %v637_v26, %v1700_v30 }
  0xa8   : > { %v1053_v29 = vpop.eup %1052  ;;  %v1704_v3 = vmul.u32.u64.low %v1672_v15, %v633_v25  ;;  %v1705_v13 = vmul.u32.u64.high %v1672_v15, %v633_v25, %v1704_v3  ;;  %v703_v44 = vadd.s32 1, %v936_v24  ;;  %v645_v40 = vmul.u32 %v1672_v15, %v629_v2 }
  0xa9   : > { %v1055_v10 = vpop.eup %1054  ;;  %v473_v48 = vxor.u32 2147483648, %v1053_v29  ;;  %v552_v6 = vor.u32 %v551_v31, %v550_v63  ;;  %v555_v32 = vshll.u32 %v554_v50, 23  ;;  %v693_v51 = vand.u32 2147483647, %v1652_v36 }
  0xaa   : > { %v470_v61 = vxor.u32 2147483648, %v1055_v10  ;;  %vm704_vm3 = vcmp.gt.s32.totalorder %v703_v44, 0  ;;  %vm647_vm4 = vc.u32 %v1701_v28, %v1704_v3  ;;  %v648_v42 = vadd.s32 1, %v1705_v13 }
  0xab   : > { %v474_v21 = vsel %vm472_vm1, %v473_v48, %v1055_v10  ;;  %v556_v20 = vor.u32 4788187, %v555_v32  ;;  %v559_v19 = vcvt.s32.f32 %v552_v6  ;;  %vm1720_vm5 = vcmp.le.f32.partialorder %v477_v34, 0.7853982 }
  0xac   : > { %v471_v22 = vsel %vm469_vm11, %v1053_v29, %v470_v61  ;;  %v705_v52 = vsel %vm704_vm3, %v703_v44, 0  ;;  %vm479_vm6 = vcmp.lt.s32.totalorder %v1355_v27, 0  ;;  %v649_v38 = vsel %vm647_vm4, %v648_v42, %v1705_v13 }
  0xad   : > { %v475_v49 = vsel %vm468_vm2, %v471_v22, %v474_v21  ;;  %v557_v5 = vand.u32 2147483647, %v556_v20  ;;  %v707_v54 = vand.u32 31, %v705_v52  ;;  %v563_v55 = vsub.s32 4, %v1649_v35 }
  0xae   : > { %v476_v33 = vsel %vm466_vm15, nan, %v475_v49  ;;  %v650_v1 = vadd.s32 %v649_v38, %v645_v40  ;;  %v700_v34 = vand.u32 8388607, %v693_v51  ;;  %v706_v11 = vshrl.u32 %v705_v52, 5 }
  0xaf   : > { %v560_v4 = vmul.f32 %v559_v19, %v557_v5  ;;  %928 = vst [vmem:[%s1632_s27 + $0x10] sm:$0xff] %v476_v33  ;;  %v708_v56 = vsub.s32 32, %v707_v54  ;;  %v710_v57 = vshll.u32 %v1185_v37, %v707_v54  ;;  %v713_v7 = vshll.u32 %v1186_v39, %v707_v54 }
  0xb0   : > { %v651_v59 = vadd.s32 536870912, %v650_v1  ;;  %v716_v60 = vshll.u32 %v1187_v41, %v707_v54  ;;  %v719_v62 = vshll.u32 %v1188_v43, %v707_v54  ;;  %v722_v14 = vshll.u32 %v1189_v45, %v707_v54 }
  0xb1   : > { %v561_v58 = vxor.u32 2147483648, %v560_v4  ;;  %v711_v0 = vshrl.u32 %v1186_v39, %v708_v56  ;;  %v714_v9 = vshrl.u32 %v1187_v41, %v708_v56  ;;  %v717_v46 = vshrl.u32 %v1188_v43, %v708_v56 }
  0xb2   : > { %v1742_v47 = vshrl.u32 %v651_v59, 30  ;;  %v720_v63 = vshrl.u32 %v1189_v45, %v708_v56  ;;  %v723_v16 = vshrl.u32 %v1190_v53, %v708_v56  ;;  %v564_v2 = vsel %vm479_vm6, %v563_v55, %v1649_v35 }
  0xb3   : > { %v562_v8 = vsel %vm479_vm6, %v561_v58, %v560_v4  ;;  %v701_v41 = vor.u32 8388608, %v700_v34  ;;  %v712_v43 = vor.u32 %v711_v0, %v710_v57  ;;  %v715_v17 = vor.u32 %v714_v9, %v713_v7 }
  0xb4   : > { %v565_v39 = vsel %vm1720_vm5, %v1355_v27, %v562_v8  ;;  %v653_v18 = vshll.u32 %v1742_v47, 30  ;;  %v721_v24 = vor.u32 %v720_v63, %v719_v62  ;;  %v718_v31 = vor.u32 %v717_v46, %v716_v60 }
  0xb5   : > { %1056 = vcosq.f32 %v565_v39  ;;  %v724_v45 = vor.u32 %v723_v16, %v722_v14  ;;  %vm725_vm7 = vcmp.lt.s32.totalorder %v706_v11, 1  ;;  %v709_v50 = vshrl.u32 %v1185_v37, %v708_v56 }
  0xb6   : > { %1058 = vsinq.f32 %v565_v39  ;;  %v654_v53 = vsub.s32 %v650_v1, %v653_v18  ;;  %vm727_vm8 = vcmp.lt.s32.totalorder %v706_v11, 3  ;;  %vm728_vm9 = vcmp.lt.s32.totalorder %v706_v11, 4 }
  0xb7   : > { %v566_v35 = vsel %vm1720_vm5, 0, %v564_v2  ;;  %v730_v25 = vsel %vm728_vm9, %v718_v31, 2102212464  ;;  %v741_v26 = vshll.u32 %v701_v41, 8  ;;  %vm726_vm10 = vcmp.lt.s32.totalorder %v706_v11, 2 }
  0xb8   : > { %v656_v29 = vsub.s32 0, %v654_v53  ;;  %v733_v30 = vsel %vm725_vm7, %v712_v43, %v715_v17  ;;  %v734_v13 = vsel %vm728_vm9, %v721_v24, 920167782  ;;  %v737_v48 = vsel %vm725_vm7, %v715_v17, %v718_v31 }
  0xb9   : > { %v735_v10 = vsel %vm727_vm8, %v718_v31, %v734_v13  ;;  %v738_v6 = vsel %vm728_vm9, %v724_v45, 1326507024  ;;  %v570_v32 = vand.u32 3, %v566_v35  ;;  %v729_v37 = vsel %vm725_vm7, %v709_v50, %v712_v43 }
  0xba   : > { %v933_v44 = vmin.u32 %v656_v29, %v654_v53  ;;  %v731_v61 = vsel %vm727_vm8, %v715_v17, %v730_v25  ;;  %v736_v40 = vsel %vm726_vm10, %v733_v30, %v735_v10  ;;  %v739_v21 = vsel %vm727_vm8, %v721_v24, %v738_v6 }
  0xbb   : > { %v740_v19 = vsel %vm726_vm10, %v737_v48, %v739_v21  ;;  %v1762_v22 = vmul.u32.u64.low %v741_v26, %v736_v40  ;;  %v1763_v42 = vmul.u32.u64.high %v741_v26, %v736_v40, %v1762_v22  ;;  %v732_v49 = vsel %vm726_vm10, %v729_v37, %v731_v61 }
  0xbc   : > { %v658_v20 = vclz %v933_v44  ;;  %v1765_v15 = vmul.u32.u64.low %v741_v26, %v740_v19  ;;  %v1766_v5 = vmul.u32.u64.high %v741_v26, %v740_v19, %v1765_v15  ;;  %vm575_vm11 = vcmp.eq.s32.totalorder %v570_v32, 2 }
  0xbd   : > { %vm571_vm12 = vcmp.lt.s32.totalorder %v570_v32, 2  ;;  %vm572_vm13 = vcmp.eq.s32.totalorder %v570_v32, 0  ;;  %v646_v4 = vadd.s32 %v1704_v3, %v1701_v28  ;;  %v748_v1 = vmul.u32 %v741_v26, %v732_v49 }
  0xbe   : > { %v934_v33 = vadd.s32 4294967294, %v658_v20  ;;  %v751_v34 = vadd.s32 1, %v1763_v42  ;;  %vm569_vm15 = vweird.f32 %v1355_v27  ;;  %vm750_vm0 = vc.u32 %v1766_v5, %v1762_v22 }
  0xbf   : > { %v1057_v52 = vpop.eup %1056  ;;  %vm592_vm1 = vcmp.lt.s32.totalorder %v1583_v12, 0  ;;  %vm1779_vm2 = vcmp.le.f32.partialorder %v590_v23, 0.7853982  ;;  %v676_v24 = vsub.s32 4, %v1742_v47  ;;  %v749_v29 = vadd.s32 %v1762_v22, %v1766_v5 }
  0xc0   : > { %v1059_v38 = vpop.eup %1058  ;;  %v576_v54 = vxor.u32 2147483648, %v1057_v52  ;;  %vm935_vm14 = vcmp.lt.s32.totalorder %v934_v33, 0  ;;  %v752_v28 = vsel %vm750_vm0, %v751_v34, %v1763_v42  ;;  %vm682_vm7 = vweird.f32 %v1583_v12 }
  0xc1   : > { %v573_v55 = vxor.u32 2147483648, %v1059_v38  ;;  %v661_v56 = vsel %vm935_vm14, 0, %v934_v33  ;;  %v753_v9 = vadd.s32 %v752_v28, %v748_v1  ;;  %v677_v35 = vsel %vm592_vm1, %v676_v24, %v1742_v47 }
  0xc2   : > { %v577_v11 = vsel %vm575_vm11, %v576_v54, %v1059_v38  ;;  %v662_v7 = vsub.s32 32, %v661_v56  ;;  %v663_v58 = vshll.u32 %v654_v53, %v661_v56  ;;  %v666_v59 = vsub.s32 4294967266, %v661_v56 }
  0xc3   : > { %v574_v57 = vsel %vm572_vm13, %v1057_v52, %v573_v55  ;;  %v754_v27 = vadd.s32 536870912, %v753_v9  ;;  %v679_v23 = vsel %vm1779_vm2, 0, %v677_v35  ;;  %vm695_vm8 = vcmp.lt.s32.totalorder %v1652_v36, 0 }
  0xc4   : > { %v578_v60 = vsel %vm571_vm12, %v574_v57, %v577_v11  ;;  %v664_v62 = vshrl.u32 %v646_v4, %v662_v7  ;;  %v667_v0 = vadd.s32 127, %v666_v59  ;;  %v683_v13 = vand.u32 3, %v679_v23 }
  0xc5   : > { %v579_v3 = vsel %vm569_vm15, nan, %v578_v60  ;;  %v755_v16 = vshrl.u32 %v754_v27, 30  ;;  %vm694_vm9 = vcmp.le.f32.partialorder %v693_v51, 0.7853982  ;;  %vm785_vm13 = vweird.f32 %v1652_v36 }
  0xc6   : > { %929 = vst [vmem:[%s1632_s27 + $0x18] sm:$0xff] %v579_v3  ;;  %v665_v46 = vor.u32 %v664_v62, %v663_v58  ;;  %v668_v14 = vshll.u32 %v667_v0, 23  ;;  %vm688_vm4 = vcmp.eq.s32.totalorder %v683_v13, 2  ;;  %vm685_vm5 = vcmp.eq.s32.totalorder %v683_v13, 0 }
  0xc7   : > { %v756_v39 = vshll.u32 %v755_v16, 30  ;;  %vm684_vm6 = vcmp.lt.s32.totalorder %v683_v13, 2  ;;  %v779_v54 = vsub.s32 4, %v755_v16 }
  0xc8   : > { %v669_v8 = vor.u32 4788187, %v668_v14  ;;  %v672_v63 = vcvt.s32.f32 %v665_v46 }
  0xc9   : > { %v757_v43 = vsub.s32 %v753_v9, %v756_v39 }
  0xca   : > { %v670_v2 = vand.u32 2147483647, %v669_v8 }
  0xcb   : > { %v759_v31 = vsub.s32 0, %v757_v43 }
  0xcc   : > { %v673_v41 = vmul.f32 %v672_v63, %v670_v2 }
  0xcd   : > { %v937_v53 = vmin.u32 %v759_v31, %v757_v43 }
  0xce   : > { %v674_v17 = vxor.u32 2147483648, %v673_v41 }
  0xcf   : > { %v761_v25 = vclz %v937_v53 }
  0xd0   : > { %v675_v45 = vsel %vm592_vm1, %v674_v17, %v673_v41 }
  0xd1   : > { %v678_v50 = vsel %vm1779_vm2, %v1583_v12, %v675_v45  ;;  %v938_v26 = vadd.s32 4294967294, %v761_v25  ;;  %v780_v12 = vsel %vm695_vm8, %v779_v54, %v755_v16 }
  0xd2   : > { %1060 = vcosq.f32 %v678_v50  ;;  %v782_v1 = vsel %vm694_vm9, 0, %v780_v12 }
  0xd3   : > { %1062 = vsinq.f32 %v678_v50  ;;  %vm939_vm3 = vcmp.lt.s32.totalorder %v938_v26, 0  ;;  %v786_v34 = vand.u32 3, %v782_v1 }
  0xd4   : > { %v764_v30 = vsel %vm939_vm3, 0, %v938_v26 }
  0xd5   : > { %v765_v10 = vsub.s32 32, %v764_v30  ;;  %v766_v48 = vshll.u32 %v757_v43, %v764_v30  ;;  %v769_v6 = vsub.s32 4294967266, %v764_v30  ;;  %vm791_vm10 = vcmp.eq.s32.totalorder %v786_v34, 2 }
  0xd6   : > { %vm788_vm11 = vcmp.eq.s32.totalorder %v786_v34, 0  ;;  %vm787_vm12 = vcmp.lt.s32.totalorder %v786_v34, 2 }
  0xd7   : > { %v767_v32 = vshrl.u32 %v749_v29, %v765_v10  ;;  %v770_v44 = vadd.s32 127, %v769_v6 }
  0xd9   : > { %v768_v47 = vor.u32 %v767_v32, %v766_v48  ;;  %v771_v61 = vshll.u32 %v770_v44, 23 }
  0xdb   : > { %v772_v19 = vor.u32 4788187, %v771_v61  ;;  %v775_v22 = vcvt.s32.f32 %v768_v47 }
  0xdc   : > { %v1061_v37 = vpop.eup %1060 }
  0xdd   : > { %v1063_v40 = vpop.eup %1062  ;;  %v689_v21 = vxor.u32 2147483648, %v1061_v37  ;;  %v773_v15 = vand.u32 2147483647, %v772_v19 }
  0xde   : > { %v686_v20 = vxor.u32 2147483648, %v1063_v40 }
  0xdf   : > { %v690_v42 = vsel %vm688_vm4, %v689_v21, %v1063_v40  ;;  %v776_v33 = vmul.f32 %v775_v22, %v773_v15 }
  0xe0   : > { %v687_v49 = vsel %vm685_vm5, %v1061_v37, %v686_v20 }
  0xe1   : > { %v691_v5 = vsel %vm684_vm6, %v687_v49, %v690_v42  ;;  %v777_v38 = vxor.u32 2147483648, %v776_v33 }
  0xe2   : > { %v692_v52 = vsel %vm682_vm7, nan, %v691_v5 }
  0xe3   : > { %940 = vst [vmem:[%s1632_s27 + $0x20] sm:$0xff] %v692_v52  ;;  %v778_v4 = vsel %vm695_vm8, %v777_v38, %v776_v33 }
  0xe4   : > { %v781_v55 = vsel %vm694_vm9, %v1652_v36, %v778_v4 }
  0xe5   : > { %1064 = vcosq.f32 %v781_v55 }
  0xe6   : > { %1066 = vsinq.f32 %v781_v55 }
  0xef   : > { %v1065_v11 = vpop.eup %1064 }
  0xf0   : > { %v1067_v56 = vpop.eup %1066  ;;  %v792_v51 = vxor.u32 2147483648, %v1065_v11 }
  0xf1   : > { %v789_v57 = vxor.u32 2147483648, %v1067_v56 }
  0xf2   : > { %v793_v7 = vsel %vm791_vm10, %v792_v51, %v1067_v56 }
  0xf3   : > { %v790_v58 = vsel %vm788_vm11, %v1065_v11, %v789_v57 }
  0xf4   : > { %v794_v59 = vsel %vm787_vm12, %v790_v58, %v793_v7 }
  0xf5   : > { %v795_v60 = vsel %vm785_vm13, nan, %v794_v59 }
  0xf6   : > { %941 = vst [vmem:[%s1632_s27 + $0x28] sm:$0xff] %v795_v60 }
  0xf7   : > { %1111 = shalt.err (!%p1108_p5)
}
  0xf8   : > { %s1112_s22 = scalar_lea.hbm %s1803_s12, 768  ;;  %s1116_s25 = scalar_lea.hbm %s1856_s1, 1536 }
  0xf9   : > { %p1113_p4 = scmp.ne.s32.totalorder %s1803_s12, %s1112_s22  ;;  %p1117_p12 = scmp.lt.u32.totalorder %s1803_s12, %s1856_s1 }
  0xfa   : > { %p1118_p1 = scmp.lt.u32.totalorder %s1116_s25, %s1112_s22  ;;  %p1120_p8 = scmp.lt.u32.totalorder %s1112_s22, %s1803_s12 }
  0xfb   : > { %p1114_p7 = pnand %p1113_p4, %p1874_p9 }
  0xfc   : > { %p1119_p3 = por %p1118_p1, %p1117_p12 }
  0xfd   : > { %p1115_p10 = pneg %p1114_p7 }
  0xfe   : > { %p1121_p11 = por %p1120_p8, %p1119_p3 }
 0x100   : > { %p1122_p0 = pnand %p1121_p11, %p1115_p10 }
 0x102   : > { %1125 = shalt.err (!%p1122_p0)
}
 0x103   : > { %s1192_s4 = smov 128   ;;  %s1193_s18 = smov 8  }
 0x104   : > { %974 = dma.vmem_to_hbm [thread:$0]  (%p1874_p9), %s1805_s30, 768, %s1803_s12, %s800_s9, %s1192_s4, %s1192_s4, %s1193_s18  }
 0x105 PF: > { %s829_s27 = sand.u32 1, %s1160_s6   ;;  %p1875_p6 = scmp.ne.s32.totalorder %s1861_s21, 0 }
 0x106   : > { %p1876_p13 = scmp.ge.s32.totalorder %s1180_s11, 2  ;;  %s830_s29 = scalar_lea.sflag [#allocation4], %s829_s27 }
 0x108   : > { %p981_p2 = pnand %p1876_p13, %p1875_p6 }
 0x10a   : > { %1155 = dma.done.wait (!%p981_p2), %s830_s29, 768  }
 0x10b   : > { %1157 = vsyncadd (!%p981_p2), %s830_s29, 4294966528  ;;  %s17_s11 = sadd.s32 1, %s1180_s11   ;;  %s1877_s6 = smov %s1164_s7 }
 0x10c   : > { %p14_p5 = scmp.ge.s32.totalorder %s17_s11, 4   ;;  %s1878_s7 = smov %s1168_s8 }
 0x10d   : > { %s1879_s8 = smov %s1260_s20  ;;  %s1880_s9 = smov %s1176_s10 }
 0x10e   : > { %s1881_s10 = smov %s1883_s14  ;;  %16 = sbr.rel (!%p14_p5) target bundleno = 6 (0x6), region = 74 }
 0x115   :  { %835 = vsyncpa [#allocation3], 1 }
 0x116   :  { %837 = vsyncpa [#allocation3 + $0x1], 1 }
 0x117   :  { %838 = vsyncpa [#allocation4], 1 }
 0x118   :  { %840 = vsyncpa [#allocation4 + $0x1], 1 }

</bundles_post_ra>
